<compile_context>
chip_gen: v5e
topology: v5e:2x2
jax: 0.10.0
libtpu: 0.0.40
codegen_flags: <defaults>
</compile_context>

<pallas_src>
import functools

import jax
import jax.numpy as jnp
from jax import lax
from jax.experimental import pallas as pl
from jax.experimental.pallas import tpu as pltpu


def _round_up(x, m):
    return ((x + m - 1) // m) * m


def _pick_t_tile(T, max_tile=1024):
    """Largest T tile that divides T, is a multiple of 8, and is <= max_tile."""
    if T <= max_tile:
        return T
    for cand in range(max_tile, 127, -8):
        if T % cand == 0:
            return cand
    # TODO(synk): ragged long T (no multiple-of-8 divisor <= max_tile) falls
    # back to a single tile per batch group.
    return T


def _pick_batch_group(B, t_tile, target_rows=512):
    """Fold G batch elements per grid step so G*t_tile ~= target matmul rows."""
    g = max(1, min(B, target_rows // max(t_tile, 1)))
    while B % g != 0:
        g -= 1
    return g


def fuse_location_weights(conv_weight, linear_weight, *,
                          compute_dtype=jnp.bfloat16):
    """Fuse Conv1d (no bias) and Linear (no bias) into one matmul weight.

      Wf[2k + ci, o] = sum_f lin[o, f] * conv[f, ci, k]

    Padded to (round_up(2K, 8), round_up(O, 128)) so the kernel operands are
    sublane/lane aligned.  Call this ONCE per weight set and pass the result
    via `tctrn_location(..., fused_weight=...)` so the fusion is not recomputed
    every decoder step.
    """
    C, cin, K = conv_weight.shape
    assert cin == 2
    O = linear_weight.shape[0]
    w = jnp.einsum("oc,cik->kio", linear_weight, conv_weight).reshape(2 * K, O)
    kr = _round_up(2 * K, 8)
    o_pad = _round_up(O, 128)
    w = jnp.pad(w, ((0, kr - 2 * K), (0, o_pad - O)))
    return w.astype(compute_dtype)


def _location_kernel(x_ref, w_ref, out_ref, xp_ref, a_ref, *,
                     t_tile, num_t, kernel_size, pad, kr, compute_dtype):
    """Fused Conv1d('same', no bias) + transpose + Linear(no bias), one tile.

    x_ref  : (G, 2, T)                  f32  full un-padded NCW batch-group slab
    w_ref  : (kr, O_pad)                cdt  fused conv+linear weight
    out_ref: (G, T_TILE, O_pad)         out  lane-dense output tile
    xp_ref : (num_t, G, 2, T_TILE+2p)   cdt  scratch: per-tile halo'ed input
    a_ref  : (kr, G*T_TILE)             cdt  scratch: fused im2col (row = 2k+ci)
    """
    g_cnt = x_ref.shape[0]
    two_k = 2 * kernel_size
    t_halo = t_tile + 2 * pad
    t_idx = pl.program_id(1)

    # Once per batch group (first T tile): cast the input to the compute dtype,
    # build the zero halo, and pre-slice it into per-tile windows at *static*
    # lane offsets (so later tile steps never need dynamic lane slicing).  Also
    # zero the sublane-padding rows of the im2col scratch so they contribute
    # exactly 0 to the matmul.
    @pl.when(t_idx == 0)
    def _init():
        xz = x_ref[...].astype(compute_dtype)                 # (G, 2, T)
        if pad > 0:
            z = jnp.zeros((g_cnt, 2, pad), compute_dtype)
            xz = jnp.concatenate([z, xz, z], axis=2)          # (G, 2, T + 2p)
        for tt in range(num_t):                               # static unroll
            xp_ref[tt] = xz[:, :, tt * t_tile: tt * t_tile + t_halo]
        if kr > two_k:
            a_ref[two_k:kr, :] = jnp.zeros((kr - two_k, a_ref.shape[1]),
                                           compute_dtype)

    # im2col straight into VMEM scratch: a[2k+ci, g*T_TILE + t] = xp[g, ci, t+k]
    xp = xp_ref[t_idx]                                        # (G, 2, T_TILE+2p)
    for g in range(g_cnt):                                    # static unroll
        for k in range(kernel_size):                          # static unroll
            a_ref[2 * k:2 * k + 2, g * t_tile:(g + 1) * t_tile] = (
                xp[g, :, k:k + t_tile])

    # One MXU matmul, contracting the leading (2K) axis of both operands
    # (transposed-LHS form -> no explicit XLU transpose of the im2col),
    # f32 accumulation via preferred_element_type.
    out = lax.dot_general(a_ref[...], w_ref[...],
                          dimension_numbers=(((0,), (0,)), ((), ())),
                          preferred_element_type=jnp.float32)
    out_ref[...] = out.reshape(out_ref.shape).astype(out_ref.dtype)


def tctrn_location(attention_weights_cat, conv_weight, linear_weight, *,
                   compute_dtype=jnp.bfloat16, out_dtype=jnp.float32,
                   fused_weight=None, t_tile=None, batch_group=None,
                   trim_output=True):
    """(B, 2, T) f32 -> (B, T, O) out_dtype, matching TCTRN_Location.forward."""
    B, cin, T = attention_weights_cat.shape
    assert cin == 2
    C, cin2, K = conv_weight.shape
    assert cin2 == 2
    # PyTorch padding=(K-1)//2 only yields 'same' length for odd K (Tacotron
    # always uses odd location kernels).
    assert K % 2 == 1, "'same'-length conv requires an odd kernel size"
    O = linear_weight.shape[0]
    pad = (K - 1) // 2
    kr = _round_up(2 * K, 8)
    o_pad = _round_up(O, 128)

    if fused_weight is None:
        # Hoist this out of the decoder loop by calling fuse_location_weights()
        # once per weight set and passing fused_weight=... here.
        fused_weight = fuse_location_weights(conv_weight, linear_weight,
                                             compute_dtype=compute_dtype)
    assert fused_weight.shape == (kr, o_pad)
    fused_weight = fused_weight.astype(compute_dtype)

    if t_tile is None:
        t_tile = _pick_t_tile(T)
    assert T % t_tile == 0 and (t_tile == T or t_tile % 8 == 0)
    num_t = T // t_tile

    if batch_group is None:
        batch_group = _pick_batch_group(B, t_tile)
    G = batch_group
    assert B % G == 0

    kernel = functools.partial(
        _location_kernel, t_tile=t_tile, num_t=num_t, kernel_size=K, pad=pad,
        kr=kr, compute_dtype=compute_dtype)

    out = pl.pallas_call(
        kernel,
        out_shape=jax.ShapeDtypeStruct((B, T, o_pad), out_dtype),
        grid=(B // G, num_t),
        in_specs=[
            # Full per-batch-group input slab, resident across all T tiles.
            pl.BlockSpec((G, 2, T), lambda b, t: (b, 0, 0)),
            # Fused weight, resident across the whole grid.
            pl.BlockSpec((kr, o_pad), lambda b, t: (0, 0)),
        ],
        out_specs=pl.BlockSpec((G, t_tile, o_pad), lambda b, t: (b, t, 0)),
        scratch_shapes=[
            pltpu.VMEM((num_t, G, 2, t_tile + 2 * pad), compute_dtype),
            pltpu.VMEM((kr, G * t_tile), compute_dtype),
        ],
        compiler_params=pltpu.CompilerParams(
            # Batch groups shard across TensorCores; the T axis must stay
            # sequential ("arbitrary") so the per-group halo scratch built at
            # t == 0 is valid for later T tiles.
            dimension_semantics=("parallel", "arbitrary")),
    )(attention_weights_cat, fused_weight)

    if trim_output and o_pad != O:
        # TODO(synk): prefer consuming the padded (..., o_pad) slab downstream;
        # this slice costs an extra HBM pass when O is not a multiple of 128.
        out = out[..., :O]
    return out


def _reference(attention_weights_cat, conv_weight, linear_weight):
    """Pure-JAX reference of the PyTorch forward (conv -> transpose -> linear)."""
    B, _, T = attention_weights_cat.shape
    C, _, K = conv_weight.shape
    pad = (K - 1) // 2
    xp = jnp.pad(attention_weights_cat, ((0, 0), (0, 0), (pad, pad)))
    conv = jnp.zeros((B, T, C), jnp.float32)
    for k in range(K):
        conv = conv + jnp.einsum("bct,fc->btf", xp[:, :, k:k + T],
                                 conv_weight[:, :, k])
    return jnp.einsum("btc,oc->bto", conv, linear_weight)


if __name__ == "__main__":
    # Small, deterministic configuration matching the module's shapes.
    B = 2                       # batch
    T = 16                      # sequence length
    location_inner_dim = 8      # conv out channels
    location_kernel_size = 5    # odd kernel -> 'same' output length
    location_out_dim = 16       # linear out dim

    key = jax.random.PRNGKey(0)
    k_x, k_cw, k_lw = jax.random.split(key, 3)

    x = jax.random.normal(k_x, (B, 2, T), dtype=jnp.float32)
    conv_w = 0.1 * jax.random.normal(
        k_cw, (location_inner_dim, 2, location_kernel_size), dtype=jnp.float32)
    lin_w = 0.1 * jax.random.normal(
        k_lw, (location_out_dim, location_inner_dim), dtype=jnp.float32)

    ref = _reference(x, conv_w, lin_w)

    # Default path: bf16 MXU operands, f32 accumulation, f32 output.
    out = jax.block_until_ready(tctrn_location(x, conv_w, lin_w))
    assert out.shape == (B, T, location_out_dim)
    assert jnp.allclose(out, ref, atol=2e-2, rtol=2e-2)

    # Exact f32 path.
    out_f32 = jax.block_until_ready(
        tctrn_location(x, conv_w, lin_w, compute_dtype=jnp.float32))
    assert out_f32.shape == (B, T, location_out_dim)
    assert jnp.allclose(out_f32, ref, atol=1e-5, rtol=1e-5)

    # Realistic-style config: O = 128 is already lane-dense; exercise the
    # hoisted / pre-fused weight path (cache once per weight set).
    T2, C2, K2, O2 = 32, 16, 7, 128
    k_x2, k_cw2, k_lw2 = jax.random.split(jax.random.PRNGKey(1), 3)
    x2 = jax.random.normal(k_x2, (B, 2, T2), dtype=jnp.float32)
    cw2 = 0.1 * jax.random.normal(k_cw2, (C2, 2, K2), dtype=jnp.float32)
    lw2 = 0.1 * jax.random.normal(k_lw2, (O2, C2), dtype=jnp.float32)
    ref2 = _reference(x2, cw2, lw2)
    w_fused2 = fuse_location_weights(cw2, lw2)      # hoisted out of the "step"
    out2 = jax.block_until_ready(
        tctrn_location(x2, cw2, lw2, fused_weight=w_fused2))
    assert out2.shape == (B, T2, O2)
    assert jnp.allclose(out2, ref2, atol=2e-2, rtol=2e-2)

    # Multi-T-tile + batch-group-folding path (forced tiling), checked in f32.
    B3, T3, C3, K3, O3 = 3, 256, 16, 7, 128
    k_x3, k_cw3, k_lw3 = jax.random.split(jax.random.PRNGKey(2), 3)
    x3 = jax.random.normal(k_x3, (B3, 2, T3), dtype=jnp.float32)
    cw3 = 0.1 * jax.random.normal(k_cw3, (C3, 2, K3), dtype=jnp.float32)
    lw3 = 0.1 * jax.random.normal(k_lw3, (O3, C3), dtype=jnp.float32)
    out3 = jax.block_until_ready(
        tctrn_location(x3, cw3, lw3, compute_dtype=jnp.float32, t_tile=128))
    assert out3.shape == (B3, T3, O3)
    assert jnp.allclose(out3, _reference(x3, cw3, lw3), atol=1e-5, rtol=1e-5)

    # Optional bf16 output (halves the dominant HBM store stream).
    out2_bf16 = jax.block_until_ready(
        tctrn_location(x2, cw2, lw2, fused_weight=w_fused2,
                       out_dtype=jnp.bfloat16))
    assert out2_bf16.dtype == jnp.bfloat16
    assert jnp.allclose(out2_bf16.astype(jnp.float32), ref2,
                        atol=3e-2, rtol=3e-2)

    print("KERNEL_OK")
</pallas_src>

<mosaic_0001>
module attributes {stable_mosaic.version = 11 : i64} {
  func.func @_location_kernel(%arg0: i32, %arg1: i32, %arg2: memref<2x2x16xf32, #tpu.memory_space<vmem>>, %arg3: memref<16x128xbf16, #tpu.memory_space<vmem>>, %arg4: memref<2x16x128xf32, #tpu.memory_space<vmem>>, %arg5: memref<1x2x2x20xbf16, #tpu.memory_space<vmem>>, %arg6: memref<16x32xbf16, #tpu.memory_space<vmem>>) attributes {dimension_semantics = [#tpu.dimension_semantics<parallel>, #tpu.dimension_semantics<arbitrary>], iteration_bounds = array<i64: 1, 1>, scalar_prefetch = 0 : i64, scratch_operands = 2 : i64, tpu.core_type = #tpu.core_type<tc>, window_params = [{transform_indices = @transform_0, window_bounds = array<i64: 2, 2, 16>}, {pipeline_mode = #tpu.pipeline_mode<synchronous>, transform_indices = @transform_1, window_bounds = array<i64: 16, 128>}, {transform_indices = @transform_2, window_bounds = array<i64: 2, 16, 128>}]} {
    %c0_i32 = arith.constant 0 : i32
    %0 = arith.cmpi eq, %arg1, %c0_i32 : i32
    %1 = arith.extui %0 : i1 to i32
    %c0_i32_0 = arith.constant 0 : i32
    %2 = arith.cmpi ne, %1, %c0_i32_0 : i32
    scf.if %2 {
      %c0_25 = arith.constant 0 : index
      %c0_26 = arith.constant 0 : index
      %c0_27 = arith.constant 0 : index
      %41 = vector.load %arg2[%c0_25, %c0_26, %c0_27] : memref<2x2x16xf32, #tpu.memory_space<vmem>>, vector<2x2x16xf32>
      %42 = arith.truncf %41 : vector<2x2x16xf32> to vector<2x2x16xbf16>
      %cst_28 = arith.constant 0.000000e+00 : bf16
      %43 = vector.broadcast %cst_28 : bf16 to vector<2x2x2xbf16>
      %44 = tpu.concatenate %43, %42, %43 in 2 : vector<2x2x2xbf16>, vector<2x2x16xbf16>, vector<2x2x2xbf16> -> vector<2x2x20xbf16>
      %c0_29 = arith.constant 0 : index
      %c0_30 = arith.constant 0 : index
      %c0_31 = arith.constant 0 : index
      %c0_32 = arith.constant 0 : index
      %45 = vector.load %arg5[%c0_29, %c0_30, %c0_31, %c0_32] : memref<1x2x2x20xbf16, #tpu.memory_space<vmem>>, vector<1x2x2x20xbf16>
      %46 = vector.shape_cast %45 : vector<1x2x2x20xbf16> to vector<2x2x20xbf16>
      %47 = vector.shape_cast %44 : vector<2x2x20xbf16> to vector<1x2x2x20xbf16>
      tpu.vector_store %arg5[%c0_29, %c0_30, %c0_31, %c0_32], %47 {strides = array<i32>} : memref<1x2x2x20xbf16, #tpu.memory_space<vmem>>, vector<1x2x2x20xbf16>,
      %cst_33 = arith.constant 0.000000e+00 : bf16
      %48 = vector.broadcast %cst_33 : bf16 to vector<6x32xbf16>
      %c10 = arith.constant 10 : index
      %c0_34 = arith.constant 0 : index
      %49 = vector.load %arg6[%c10, %c0_34] : memref<16x32xbf16, #tpu.memory_space<vmem>>, vector<6x32xbf16>
      tpu.vector_store %arg6[%c10, %c0_34], %48 {strides = array<i32>} : memref<16x32xbf16, #tpu.memory_space<vmem>>, vector<6x32xbf16>,
    } else {
    }
    %3 = arith.index_cast %arg1 : i32 to index
    %c0 = arith.constant 0 : index
    %c0_1 = arith.constant 0 : index
    %c0_2 = arith.constant 0 : index
    %4 = vector.load %arg5[%3, %c0, %c0_1, %c0_2] : memref<1x2x2x20xbf16, #tpu.memory_space<vmem>>, vector<1x2x2x20xbf16>
    %5 = vector.shape_cast %4 : vector<1x2x2x20xbf16> to vector<2x2x20xbf16>
    %6 = vector.extract_strided_slice %5 {offsets = [0, 0, 0], sizes = [1, 2, 16], strides = [1, 1, 1]} : vector<2x2x20xbf16> to vector<1x2x16xbf16>
    %7 = vector.shape_cast %6 : vector<1x2x16xbf16> to vector<2x16xbf16>
    %c0_3 = arith.constant 0 : index
    %c0_4 = arith.constant 0 : index
    %8 = vector.load %arg6[%c0_3, %c0_4] : memref<16x32xbf16, #tpu.memory_space<vmem>>, vector<2x16xbf16>
    tpu.vector_store %arg6[%c0_3, %c0_4], %7 {strides = array<i32>} : memref<16x32xbf16, #tpu.memory_space<vmem>>, vector<2x16xbf16>,
    %9 = vector.extract_strided_slice %5 {offsets = [0, 0, 1], sizes = [1, 2, 16], strides = [1, 1, 1]} : vector<2x2x20xbf16> to vector<1x2x16xbf16>
    %10 = vector.shape_cast %9 : vector<1x2x16xbf16> to vector<2x16xbf16>
    %c2 = arith.constant 2 : index
    %c0_5 = arith.constant 0 : index
    %11 = vector.load %arg6[%c2, %c0_5] : memref<16x32xbf16, #tpu.memory_space<vmem>>, vector<2x16xbf16>
    tpu.vector_store %arg6[%c2, %c0_5], %10 {strides = array<i32>} : memref<16x32xbf16, #tpu.memory_space<vmem>>, vector<2x16xbf16>,
    %12 = vector.extract_strided_slice %5 {offsets = [0, 0, 2], sizes = [1, 2, 16], strides = [1, 1, 1]} : vector<2x2x20xbf16> to vector<1x2x16xbf16>
    %13 = vector.shape_cast %12 : vector<1x2x16xbf16> to vector<2x16xbf16>
    %c4 = arith.constant 4 : index
    %c0_6 = arith.constant 0 : index
    %14 = vector.load %arg6[%c4, %c0_6] : memref<16x32xbf16, #tpu.memory_space<vmem>>, vector<2x16xbf16>
    tpu.vector_store %arg6[%c4, %c0_6], %13 {strides = array<i32>} : memref<16x32xbf16, #tpu.memory_space<vmem>>, vector<2x16xbf16>,
    %15 = vector.extract_strided_slice %5 {offsets = [0, 0, 3], sizes = [1, 2, 16], strides = [1, 1, 1]} : vector<2x2x20xbf16> to vector<1x2x16xbf16>
    %16 = vector.shape_cast %15 : vector<1x2x16xbf16> to vector<2x16xbf16>
    %c6 = arith.constant 6 : index
    %c0_7 = arith.constant 0 : index
    %17 = vector.load %arg6[%c6, %c0_7] : memref<16x32xbf16, #tpu.memory_space<vmem>>, vector<2x16xbf16>
    tpu.vector_store %arg6[%c6, %c0_7], %16 {strides = array<i32>} : memref<16x32xbf16, #tpu.memory_space<vmem>>, vector<2x16xbf16>,
    %18 = vector.extract_strided_slice %5 {offsets = [0, 0, 4], sizes = [1, 2, 16], strides = [1, 1, 1]} : vector<2x2x20xbf16> to vector<1x2x16xbf16>
    %19 = vector.shape_cast %18 : vector<1x2x16xbf16> to vector<2x16xbf16>
    %c8 = arith.constant 8 : index
    %c0_8 = arith.constant 0 : index
    %20 = vector.load %arg6[%c8, %c0_8] : memref<16x32xbf16, #tpu.memory_space<vmem>>, vector<2x16xbf16>
    tpu.vector_store %arg6[%c8, %c0_8], %19 {strides = array<i32>} : memref<16x32xbf16, #tpu.memory_space<vmem>>, vector<2x16xbf16>,
    %21 = vector.extract_strided_slice %5 {offsets = [1, 0, 0], sizes = [1, 2, 16], strides = [1, 1, 1]} : vector<2x2x20xbf16> to vector<1x2x16xbf16>
    %22 = vector.shape_cast %21 : vector<1x2x16xbf16> to vector<2x16xbf16>
    %c0_9 = arith.constant 0 : index
    %c16 = arith.constant 16 : index
    %23 = vector.load %arg6[%c0_9, %c16] : memref<16x32xbf16, #tpu.memory_space<vmem>>, vector<2x16xbf16>
    tpu.vector_store %arg6[%c0_9, %c16], %22 {strides = array<i32>} : memref<16x32xbf16, #tpu.memory_space<vmem>>, vector<2x16xbf16>,
    %24 = vector.extract_strided_slice %5 {offsets = [1, 0, 1], sizes = [1, 2, 16], strides = [1, 1, 1]} : vector<2x2x20xbf16> to vector<1x2x16xbf16>
    %25 = vector.shape_cast %24 : vector<1x2x16xbf16> to vector<2x16xbf16>
    %c2_10 = arith.constant 2 : index
    %c16_11 = arith.constant 16 : index
    %26 = vector.load %arg6[%c2_10, %c16_11] : memref<16x32xbf16, #tpu.memory_space<vmem>>, vector<2x16xbf16>
    tpu.vector_store %arg6[%c2_10, %c16_11], %25 {strides = array<i32>} : memref<16x32xbf16, #tpu.memory_space<vmem>>, vector<2x16xbf16>,
    %27 = vector.extract_strided_slice %5 {offsets = [1, 0, 2], sizes = [1, 2, 16], strides = [1, 1, 1]} : vector<2x2x20xbf16> to vector<1x2x16xbf16>
    %28 = vector.shape_cast %27 : vector<1x2x16xbf16> to vector<2x16xbf16>
    %c4_12 = arith.constant 4 : index
    %c16_13 = arith.constant 16 : index
    %29 = vector.load %arg6[%c4_12, %c16_13] : memref<16x32xbf16, #tpu.memory_space<vmem>>, vector<2x16xbf16>
    tpu.vector_store %arg6[%c4_12, %c16_13], %28 {strides = array<i32>} : memref<16x32xbf16, #tpu.memory_space<vmem>>, vector<2x16xbf16>,
    %30 = vector.extract_strided_slice %5 {offsets = [1, 0, 3], sizes = [1, 2, 16], strides = [1, 1, 1]} : vector<2x2x20xbf16> to vector<1x2x16xbf16>
    %31 = vector.shape_cast %30 : vector<1x2x16xbf16> to vector<2x16xbf16>
    %c6_14 = arith.constant 6 : index
    %c16_15 = arith.constant 16 : index
    %32 = vector.load %arg6[%c6_14, %c16_15] : memref<16x32xbf16, #tpu.memory_space<vmem>>, vector<2x16xbf16>
    tpu.vector_store %arg6[%c6_14, %c16_15], %31 {strides = array<i32>} : memref<16x32xbf16, #tpu.memory_space<vmem>>, vector<2x16xbf16>,
    %33 = vector.extract_strided_slice %5 {offsets = [1, 0, 4], sizes = [1, 2, 16], strides = [1, 1, 1]} : vector<2x2x20xbf16> to vector<1x2x16xbf16>
    %34 = vector.shape_cast %33 : vector<1x2x16xbf16> to vector<2x16xbf16>
    %c8_16 = arith.constant 8 : index
    %c16_17 = arith.constant 16 : index
    %35 = vector.load %arg6[%c8_16, %c16_17] : memref<16x32xbf16, #tpu.memory_space<vmem>>, vector<2x16xbf16>
    tpu.vector_store %arg6[%c8_16, %c16_17], %34 {strides = array<i32>} : memref<16x32xbf16, #tpu.memory_space<vmem>>, vector<2x16xbf16>,
    %c0_18 = arith.constant 0 : index
    %c0_19 = arith.constant 0 : index
    %36 = vector.load %arg6[%c0_18, %c0_19] : memref<16x32xbf16, #tpu.memory_space<vmem>>, vector<16x32xbf16>
    %c0_20 = arith.constant 0 : index
    %c0_21 = arith.constant 0 : index
    %37 = vector.load %arg3[%c0_20, %c0_21] : memref<16x128xbf16, #tpu.memory_space<vmem>>, vector<16x128xbf16>
    %cst = arith.constant dense<0.000000e+00> : vector<32x128xf32>
    %38 = tpu.matmul %36, %37, %cst {dimension_numbers = #tpu.dot_dimension_numbers<[0], [0], [1], [1], [0, 1, 1, 1], [], []>} : vector<16x32xbf16>, vector<16x128xbf16>, vector<32x128xf32> -> vector<32x128xf32>
    %39 = vector.shape_cast %38 : vector<32x128xf32> to vector<2x16x128xf32>
    %c0_22 = arith.constant 0 : index
    %c0_23 = arith.constant 0 : index
    %c0_24 = arith.constant 0 : index
    %40 = vector.load %arg4[%c0_22, %c0_23, %c0_24] : memref<2x16x128xf32, #tpu.memory_space<vmem>>, vector<2x16x128xf32>
    tpu.vector_store %arg4[%c0_22, %c0_23, %c0_24], %39 {strides = array<i32>} : memref<2x16x128xf32, #tpu.memory_space<vmem>>, vector<2x16x128xf32>,
    return
  }
  func.func @transform_0(%arg0: i32, %arg1: i32) -> (i32, i32, i32) {
    %c0_i32 = arith.constant 0 : i32
    %c0_i32_0 = arith.constant 0 : i32
    %c0_i32_1 = arith.constant 0 : i32
    return %arg0, %c0_i32, %c0_i32_0 : i32, i32, i32
  }
  func.func @transform_1(%arg0: i32, %arg1: i32) -> (i32, i32) {
    %c0_i32 = arith.constant 0 : i32
    %c0_i32_0 = arith.constant 0 : i32
    %c0_i32_1 = arith.constant 0 : i32
    return %c0_i32, %c0_i32_0 : i32, i32
  }
  func.func @transform_2(%arg0: i32, %arg1: i32) -> (i32, i32, i32) {
    %c0_i32 = arith.constant 0 : i32
    %c0_i32_0 = arith.constant 0 : i32
    return %arg0, %arg1, %c0_i32 : i32, i32, i32
  }
}

</mosaic_0001>

<bundles_post_ra>
// kernel: tpu_custom_call.1
= control target key start
LH: loop header
LB: loop body
LE: loop exit
PB: predicated region body
PF: predicated region fallthrough
CT: control target
= control target key end

     0   :  { %7 = vsyncpa [#allocation5], 0  ;;  %s402_s0 = inlined_call_operand.hbm [shape: f32[2,2,16], index: 0, kind: input, shape index: {}]   ;;  %s403_s1 = inlined_call_operand.hbm [shape: bf16[16,128], index: 1, kind: input, shape index: {}]   ;;  %s404_s2 = inlined_call_operand.hbm [shape: f32[2,16,128], index: 2, kind: output, shape index: {}]  }
   0x1   :  { %8 = vsyncpa [#allocation8], 0 }
   0x2   :  { %9 = vsyncpa [#allocation6], 0  ;;  %s14_s11 = sshll.u32 %s402_s0, 4  ;;  %s355_s12 = smov [#allocation4]   ;;  %s15_s11 = int_to_ptr.hbm [resolvable:$true] %s14_s11 }
   0x3   :  { %s16_s13 = sshll.u32 %s355_s12, 4  ;;  %s27_s16 = sshll.u32 %s403_s1, 4  ;;  %s17_s13 = int_to_ptr.vmem [resolvable:$true] %s16_s13  ;;  %s28_s16 = int_to_ptr.hbm [resolvable:$true] %s27_s16 }
   0x4   :  { %s356_s17 = smov 32   ;;  %s357_s18 = smov 2  }
   0x5   :  { %22 = dma.hbm_to_vmem [thread:$0]  %s15_s11, 64, %s17_s13, [#allocation5], %s356_s17, %s356_s17, %s357_s18  }
   0x6   :  { %s358_s19 = smov [#allocation7]   ;;  %s359_s21 = smov 64  }
   0x7   :  { %s29_s20 = sshll.u32 %s358_s19, 4  ;;  %s360_s22 = smov 4   ;;  %s30_s20 = int_to_ptr.vmem [resolvable:$true] %s29_s20 }
   0x8   :  { %35 = dma.hbm_to_vmem [thread:$0]  %s28_s16, 128, %s30_s20, [#allocation8], %s359_s21, %s359_s21, %s360_s22  }
   0x9   :  { %349 = dma.done.wait [#allocation5], 64  }
   0xa   :  { %350 = vsyncadd [#allocation5], 4294967232 }
   0xb   :  { %351 = dma.done.wait [#allocation8], 128  }
   0xc   :  { %352 = vsyncadd [#allocation8], 4294967168  ;;  %v49_v0 = vld [vmem:[#allocation4] sm:$0x3]  ;;  %v50_v1 = vld [vmem:[#allocation4 + $0x2] sm:$0x3] }
   0xd   :  { %v51_v2 = vpack.c.bf16 %v49_v0, %v49_v0  ;;  %v52_v4 = vpack.c.bf16 %v50_v1, %v50_v1  ;;  %vm63_vm0 = vcmask 15360   ;;  %vm69_vm1 = vcmask 146432   ;;  %s361_s0 = smov 127   ;;  %s362_s1 = smov 126   ;;  %v256_v33 = vld [vmem:[#allocation7] sm:$0xff] }
   0xe   :  { %vm74_vm2 = vcmask 155648   ;;  %vm83_vm3 = vcmask 122880   ;;  %s363_s23 = smov 125   ;;  %s364_s24 = smov 124   ;;  %vm111_vm4 = vcmask 125955   ;;  %vm93_vm5 = vcmask 123905   ;;  %209 = vmatpush.bf16.msra.mxu0 %v256_v33  ;;  %257 = vmatpush.bf16.msra.mxu1 %v256_v33 }
   0xf   :  { %v55_v3 = vunpack.c.l.b16 %v51_v2  ;;  %v56_v6 = vunpack.c.l.b16 %v52_v4  ;;  %s365_s25 = smov 16   ;;  %s366_s26 = smov 15   ;;  %vm102_vm6 = vcmask 124930   ;;  %vm145_vm7 = vcmask 256130  }
  0x10   :  { %s367_s27 = smov 14   ;;  %s368_s28 = smov 13   ;;  %vm127_vm8 = vcmask 254080   ;;  %vm77_vm9 = vcmask 257025   ;;  %v370_v31 = vmov 0   ;;  %vm136_vm10 = vcmask 255105  }
  0x11   :  { %v57_v5 = vpack.c.b16 %v55_v3, %v55_v3  ;;  %v58_v7 = vpack.c.b16 %v56_v6, %v56_v6  ;;  %s369_s29 = smov 12   ;;  %78 = vst.msk [vmem:[#allocation3 + $0x4] sm:$0xe] %vm77_vm9, %v370_v31  ;;  %vm154_vm11 = vcmask 257155   ;;  %vm195_vm12 = vcmask 130048   ;;  %s371_s30 = smov [#allocation9]  }
  0x12   :  { %s229_s3 = sshll.u32 %s371_s30, 4  ;;  %s231_s6 = sshll.u32 %s404_s2, 4  ;;  %s230_s3 = int_to_ptr.vmem [resolvable:$true] %s229_s3  ;;  %s232_s6 = int_to_ptr.hbm [resolvable:$true] %s231_s6 }
  0x13   :  { %59 = vrot.lane.b32.xlu0 %v57_v5, %s357_s18  ;;  %s372_s7 = smov 128   ;;  %s373_s8 = smov 8  }
  0x1b   :  { %61 = vrot.lane.b32.xlu0 %v58_v7, %s357_s18 }
  0x85   :  { %v60_v8 = vpop.permute.xlu0 %59 }
  0x86   :  { %v66_v9 = vsel %vm63_vm0, 0, %v60_v8 }
  0x87   :  { %v70_v10 = vsel %vm69_vm1, %v66_v9, 0 }
  0x88   :  { %75 = vst.msk [vmem:[#allocation2] sm:$0x1] %vm74_vm2, %v70_v10 }
  0x8d   :  { %v62_v11 = vpop.permute.xlu0 %61 }
  0x8e   :  { %v68_v12 = vsel %vm63_vm0, 0, %v62_v11 }
  0x8f   :  { %v81_v13 = vld [vmem:[#allocation2] sm:$0x1]  ;;  %v72_v14 = vsel %vm69_vm1, %v68_v12, 0 }
  0x90   :  { %87 = vst [vmem:[#allocation1 + $0x1] ss:$4 sm:$0xff] %v81_v13 }
  0x91   :  { %76 = vst.msk [vmem:[#allocation2 + $0x1] sm:$0x1] %vm74_vm2, %v72_v14 }
  0x92   :  { %84 = vst.msk [vmem:[#allocation3] sm:$0x1] %vm83_vm3, %v81_v13 }
  0x97   :  { %v88_v15 = vld [vmem:[#allocation1] sm:$0xff] }
  0x98   :  { %90 = vrot.lane.b32.xlu1 %v88_v15, %s361_s0  ;;  %96 = vst [vmem:[#allocation1 + $0x2] ss:$4 sm:$0xff] %v81_v13  ;;  %v82_v18 = vld [vmem:[#allocation2 + $0x1] sm:$0x1] }
  0x9f   :  { %v97_v16 = vld [vmem:[#allocation1] sm:$0xff] }
  0xa0   :  { %99 = vrot.lane.b32.xlu1 %v97_v16, %s362_s1  ;;  %105 = vst [vmem:[#allocation1 + $0x3] ss:$4 sm:$0xff] %v81_v13 }
  0xa7   :  { %v106_v17 = vld [vmem:[#allocation1] sm:$0xff] }
  0xa8   :  { %108 = vrot.lane.b32.xlu2 %v106_v17, %s363_s23  ;;  %113 = vst [vmem:[#allocation1] ss:$4 sm:$0xff] %v81_v13 }
  0xaf   :  { %v114_v19 = vld [vmem:[#allocation1] sm:$0xff] }
  0xb0   :  { %116 = vrot.lane.b32.xlu2 %v114_v19, %s364_s24  ;;  %121 = vst [vmem:[#allocation1] ss:$4 sm:$0xff] %v82_v18 }
  0xb7   :  { %v122_v20 = vld [vmem:[#allocation1] sm:$0xff] }
  0xb8   :  { %124 = vrot.lane.b32.xlu0 %v122_v20, %s365_s25  ;;  %130 = vst [vmem:[#allocation1 + $0x1] ss:$4 sm:$0xff] %v82_v18 }
  0xbf   :  { %v131_v21 = vld [vmem:[#allocation1] sm:$0xff] }
  0xc0   :  { %133 = vrot.lane.b32.xlu1 %v131_v21, %s366_s26  ;;  %139 = vst [vmem:[#allocation1 + $0x2] ss:$4 sm:$0xff] %v82_v18 }
  0xc7   :  { %v140_v22 = vld [vmem:[#allocation1] sm:$0xff] }
  0xc8   :  { %142 = vrot.lane.b32.xlu2 %v140_v22, %s367_s27  ;;  %148 = vst [vmem:[#allocation1 + $0x3] ss:$4 sm:$0xff] %v82_v18 }
  0xcf   :  { %v149_v23 = vld [vmem:[#allocation1] sm:$0xff] }
  0xd0   :  { %151 = vrot.lane.b32.xlu0 %v149_v23, %s368_s28  ;;  %156 = vst [vmem:[#allocation1] ss:$4 sm:$0xff] %v82_v18 }
  0xd7   :  { %v157_v24 = vld [vmem:[#allocation1] sm:$0xff] }
  0xd8   :  { %159 = vrot.lane.b32.xlu1 %v157_v24, %s369_s29 }
 0x102   :  { %v109_v25 = vpop.permute.xlu2 %108 }
 0x103   :  { %112 = vst.msk [vmem:[#allocation3] sm:$0x8] %vm111_vm4, %v109_v25 }
 0x10a   :  { %v91_v26 = vpop.permute.xlu1 %90  ;;  %v117_v27 = vpop.permute.xlu2 %116 }
 0x10b   :  { %94 = vst.msk [vmem:[#allocation3] sm:$0x2] %vm93_vm5, %v91_v26 }
 0x10c   :  { %119 = vst.msk [vmem:[#allocation3 + $0x4] sm:$0x1] %vm83_vm3, %v117_v27 }
 0x112   :  { %v100_v28 = vpop.permute.xlu1 %99 }
 0x113   :  { %103 = vst.msk [vmem:[#allocation3] sm:$0x4] %vm102_vm6, %v100_v28 }
 0x122   :  { %v143_v29 = vpop.permute.xlu2 %142 }
 0x123   :  { %146 = vst.msk [vmem:[#allocation3] sm:$0x4] %vm145_vm7, %v143_v29 }
 0x12a   :  { %v125_v30 = vpop.permute.xlu0 %124 }
 0x12b   :  { %128 = vst.msk [vmem:[#allocation3] sm:$0x1] %vm127_vm8, %v125_v30 }
 0x132   :  { %v134_v32 = vpop.permute.xlu1 %133 }
 0x133   :  { %137 = vst.msk [vmem:[#allocation3] sm:$0x2] %vm136_vm10, %v134_v32 }
 0x142   :  { %v152_v34 = vpop.permute.xlu0 %151 }
 0x143   :  { %155 = vst.msk [vmem:[#allocation3] sm:$0x8] %vm154_vm11, %v152_v34 }
 0x14a   :  { %v160_v35 = vpop.permute.xlu1 %159 }
 0x14b   :  { %162 = vst.msk [vmem:[#allocation3 + $0x4] sm:$0x1] %vm127_vm8, %v160_v35 }
 0x152   :  { %v255_v36 = vld [vmem:[#allocation3] sm:$0xff] }
 0x153   :  { %173 = vxpose.xlu2.c.b16.start.end [1/1] (short) (narrow) %v255_v36, 32 }
 0x1f4   :  { %v181_v37 = vpop.trf.xlu2 }
 0x1f5   :  { %253 = vmatmul.msk.bf16.vlgmr.msra.gmra.mxu0 %vm195_vm12, %v181_v37 }
 0x204   :  { %v182_v38 = vpop.trf.xlu2 }
 0x205   :  { %254 = vmatmul.msk.bf16.vlgmr.msra.gmra.mxu1 %vm195_vm12, %v182_v38 }
 0x272   :  { %v211_v39 = vpop.f32.mrf.mxu0 }
 0x273   :  { %221 = vst [vmem:[#allocation9] sm:$0xff] %v211_v39 }
 0x27a   :  { %v213_v40 = vpop.f32.mrf.mxu0 }
 0x27b   :  { %222 = vst [vmem:[#allocation9 + $0x8] sm:$0xff] %v213_v40 }
 0x282   :  { %v216_v41 = vpop.f32.mrf.mxu1 }
 0x283   :  { %223 = vst [vmem:[#allocation9 + $0x10] sm:$0xff] %v216_v41 }
 0x28a   :  { %v218_v42 = vpop.f32.mrf.mxu1 }
 0x28b   :  { %224 = vst [vmem:[#allocation9 + $0x18] sm:$0xff] %v218_v42 }
 0x28c   :  { %237 = dma.vmem_to_hbm [thread:$0]  %s230_s3, 512, %s232_s6, [#allocation6], %s372_s7, %s372_s7, %s373_s8  }
 0x28d   :  { %353 = dma.done.wait [#allocation6], 512  }
 0x28e   :  { %354 = vsyncadd [#allocation6], 4294966784 }
 0x28f   :  { %242 = vsyncpa [#allocation5], 1 }
 0x290   :  { %243 = vsyncpa [#allocation8], 1 }
 0x291   :  { %244 = vsyncpa [#allocation6], 1 }

</bundles_post_ra>
